<compile_context>
chip_gen: v6e
topology: v6e:2x2x1
jax: 0.10.0
libtpu: 0.0.40
codegen_flags: <defaults>
</compile_context>

<pallas_src>
import jax
import jax.numpy as jnp
from jax import lax
from jax.experimental import pallas as pl
from jax.experimental.pallas import tpu as pltpu

NNLS_ITERS = 200          # projected-gradient steps for nls_projgrad
SINKHORN_ITERS = 100      # fixed Sinkhorn iterations (method='approx')
SINKHORN_GAMMA = 1.0      # default gamma of OptimalTransportLayer
EPS = 1e-12

VMEM_LIMIT = 48 * 1024 * 1024   # fits v7x's 64 MiB VMEM with headroom

# preferred tile sizes (multiples of the (8/16, 128) layout tiles); dims smaller
# than the preference are used whole (block == full dim is always legal).
TM, TN, TK = 256, 256, 512      # cosine: spots x cells x genes
TS_NNLS, TG_NNLS = 512, 512     # NNLS:   spots (lanes) x genes (contraction)


def _round_up(x, m):
    return (x + m - 1) // m * m


def _pick_tile(dim, pref):
    return pref if dim >= pref else dim


def _pad2(x, rows, cols):
    r, c = x.shape
    if r == rows and c == cols:
        return x
    return jnp.pad(x, ((0, rows - r), (0, cols - c)))


def _full_spec(shape):
    # single whole-array block (block_shape == array shape is always legal)
    return pl.BlockSpec(shape, lambda: tuple(0 for _ in shape))


# --------------------------------------------------------------------------
# Kernel 1 (fused): cosine distance -> Gibbs kernel
#   M[i, j] = 1 - <st_i, sc_j> / (|st_i| |sc_j|)   (== ot.dist(st, sc, 'cosine'))
#   K[i, j] = exp(-gamma * M[i, j])                (fed straight to Sinkhorn)
# --------------------------------------------------------------------------
def cos_to_k_kernel(st_ref, sc_ref, ist_ref, isc_ref, k_ref, acc_ref):
    kk = pl.program_id(2)

    @pl.when(kk == 0)
    def _():
        acc_ref[...] = jnp.zeros_like(acc_ref)

    # bf16 MXU inputs, f32 accumulation; contraction over genes, no transpose.
    acc_ref[...] += lax.dot_general(
        st_ref[...], sc_ref[...],
        (((1,), (1,)), ((), ())),
        preferred_element_type=jnp.float32,
    )

    @pl.when(kk == pl.num_programs(2) - 1)
    def _():
        # rank-1 scaling with precomputed inverse row norms -> cosine similarity
        cos = acc_ref[...] * ist_ref[...] * isc_ref[...]
        # M = 1 - cos; emit K = exp(-gamma * M) directly so M never hits HBM.
        k_ref[...] = jnp.exp(-SINKHORN_GAMMA * (1.0 - cos))


def cosine_gibbs(st_x, sc_x, inv_st, inv_sc):
    S, G = st_x.shape
    C, _ = sc_x.shape
    tm, tn, tk = _pick_tile(S, TM), _pick_tile(C, TN), _pick_tile(G, TK)
    Sp, Cp, Gp = _round_up(S, tm), _round_up(C, tn), _round_up(G, tk)

    st_p = _pad2(st_x, Sp, Gp).astype(jnp.bfloat16)   # bf16 tiles: half the DMA/VMEM
    sc_p = _pad2(sc_x, Cp, Gp).astype(jnp.bfloat16)
    ist_p = _pad2(inv_st, Sp, 1)
    isc_p = _pad2(inv_sc, 1, Cp)

    grid = (Sp // tm, Cp // tn, Gp // tk)
    kmat = pl.pallas_call(
        cos_to_k_kernel,
        out_shape=jax.ShapeDtypeStruct((Sp, Cp), jnp.float32),
        grid_spec=pltpu.PrefetchScalarGridSpec(
            num_scalar_prefetch=0,
            grid=grid,
            in_specs=[
                pl.BlockSpec((tm, tk), lambda i, j, k: (i, k)),
                pl.BlockSpec((tn, tk), lambda i, j, k: (j, k)),
                pl.BlockSpec((tm, 1), lambda i, j, k: (i, 0)),
                pl.BlockSpec((1, tn), lambda i, j, k: (0, j)),
            ],
            out_specs=pl.BlockSpec((tm, tn), lambda i, j, k: (i, j)),
            scratch_shapes=[pltpu.VMEM((tm, tn), jnp.float32)],
        ),
        compiler_params=pltpu.CompilerParams(
            dimension_semantics=("parallel", "parallel", "arbitrary"),
            vmem_limit_bytes=VMEM_LIMIT,
        ),
        cost_estimate=pl.CostEstimate(
            flops=2 * Sp * Cp * Gp,
            transcendentals=Sp * Cp,
            bytes_accessed=2 * (Sp * Gp + Cp * Gp) + 4 * Sp * Cp,
        ),
    )(st_p, sc_p, ist_p, isc_p)
    return kmat[:S, :C]


# --------------------------------------------------------------------------
# Kernel 2: NNLS branch, tiled over spots.
#   nls_projgrad(markers.T, st.T): min_{X>=0} ||markers.T @ X - st.T||_F^2,
#   X: (K, S).  Then W = X.T row-normalized -> (S, K).
#   State is kept lane-dense as (K, tS); normalization over celltypes is
#   axis 0 in this layout; the (S, K) transpose happens in the wrapper.
# TODO(synk): exact step-size schedule of nls_projgrad is not in the provided
#             source; a Lipschitz (1/trace(AtA)) projected gradient is used.
# --------------------------------------------------------------------------
def nnls_kernel(mk_ref, st_ref, x_ref, ata_ref, atb_ref):
    g = pl.program_id(1)

    @pl.when(g == 0)
    def _():
        ata_ref[...] = jnp.zeros_like(ata_ref)
        atb_ref[...] = jnp.zeros_like(atb_ref)

    mk = mk_ref[...]                                   # (K, tG) bf16
    st = st_ref[...]                                   # (tS, tG) bf16
    ata_ref[...] += lax.dot_general(mk, mk, (((1,), (1,)), ((), ())),
                                    preferred_element_type=jnp.float32)
    atb_ref[...] += lax.dot_general(mk, st, (((1,), (1,)), ((), ())),
                                    preferred_element_type=jnp.float32)

    @pl.when(g == pl.num_programs(1) - 1)
    def _():
        AtA = ata_ref[...]                             # (K, K)
        AtB = atb_ref[...]                             # (K, tS)
        # tighter Lipschitz bound: trace(AtA) >= lambda_max(AtA) for PSD AtA
        ii = lax.broadcasted_iota(jnp.int32, AtA.shape, 0)
        jj = lax.broadcasted_iota(jnp.int32, AtA.shape, 1)
        trace = jnp.sum(jnp.where(ii == jj, AtA, 0.0))
        step = 1.0 / (trace + EPS)

        def body(_, X):
            grad = jnp.dot(AtA, X, preferred_element_type=jnp.float32) - AtB
            return jnp.maximum(X - step * grad, 0.0)

        X = lax.fori_loop(0, NNLS_ITERS, body, jnp.zeros_like(AtB))
        # normalize over cell types (axis 0 in the lane-dense (K, tS) layout)
        denom = jnp.sum(X, axis=0, keepdims=True)
        x_ref[...] = X / jnp.maximum(denom, EPS)


def nnls_forward(markers, st_x):
    Kc, G = markers.shape
    S, _ = st_x.shape
    ts, tg = _pick_tile(S, TS_NNLS), _pick_tile(G, TG_NNLS)
    Sp, Gp = _round_up(S, ts), _round_up(G, tg)

    mk_p = _pad2(markers, Kc, Gp).astype(jnp.bfloat16)
    st_p = _pad2(st_x, Sp, Gp).astype(jnp.bfloat16)

    grid = (Sp // ts, Gp // tg)
    x_ks = pl.pallas_call(
        nnls_kernel,
        out_shape=jax.ShapeDtypeStruct((Kc, Sp), jnp.float32),
        grid_spec=pltpu.PrefetchScalarGridSpec(
            num_scalar_prefetch=0,
            grid=grid,
            in_specs=[
                pl.BlockSpec((Kc, tg), lambda i, g: (0, g)),
                pl.BlockSpec((ts, tg), lambda i, g: (i, g)),
            ],
            out_specs=pl.BlockSpec((Kc, ts), lambda i, g: (0, i)),
            scratch_shapes=[
                pltpu.VMEM((Kc, Kc), jnp.float32),
                pltpu.VMEM((Kc, ts), jnp.float32),
            ],
        ),
        compiler_params=pltpu.CompilerParams(
            dimension_semantics=("parallel", "arbitrary"),
            vmem_limit_bytes=VMEM_LIMIT,
        ),
        cost_estimate=pl.CostEstimate(
            flops=2 * Kc * Gp * (Kc + Sp) + 2 * Kc * Kc * Sp * NNLS_ITERS,
            transcendentals=0,
            bytes_accessed=2 * (Kc * Gp + Sp * Gp) + 4 * Kc * Sp,
        ),
    )(mk_p, st_p)
    # lane-dense (K, S) in-kernel; tiny transpose to (S, K) in the wrapper
    return x_ks[:, :S].T


# --------------------------------------------------------------------------
# Kernel 3: OptimalTransportLayer(method='approx') = Sinkhorn with uniform
# marginals, dual u/v scaling form, plus scDOT's column normalization
#   OT_output = P / P.sum(0),  which reduces to  out[i,j] = u_i K_ij / (K^T u)_j.
# K is read-only across all 100 iterations (no full-matrix rewrites).
# TODO(synk): the torch layer early-exits on |beta - c| <= eps; a fixed number
#             of iterations is run here (same fixed point).
# TODO(synk): for very large (S, C) the Gibbs kernel no longer fits in one VMEM
#             block; tile the per-iteration matvecs over a grid in that regime.
# --------------------------------------------------------------------------
def sinkhorn_kernel(k_ref, p_ref):
    K = k_ref[...]                                    # (S, C) Gibbs kernel, f32
    S, C = K.shape
    r = 1.0 / S                                       # uniform marginals
    c = 1.0 / C

    def body(_, carry):
        u, v = carry
        Kv = jnp.sum(K * v, axis=1, keepdims=True)            # (S, 1)
        u = r * pl.reciprocal(Kv, approx=True)                # EUP, ~free slot
        KTu = jnp.sum(K * u, axis=0, keepdims=True)           # (1, C)
        v = c * pl.reciprocal(KTu, approx=True)
        return u, v

    u0 = jnp.ones((S, 1), jnp.float32)
    v0 = jnp.ones((1, C), jnp.float32)
    u, _ = lax.fori_loop(0, SINKHORN_ITERS, body, (u0, v0))

    # P = diag(u) K diag(v); the column normalization P / P.sum(0) cancels v:
    #   out[i, j] = u_i K_ij / (K^T u)_j   (exact divide -> columns sum to 1)
    s = jnp.sum(K * u, axis=0, keepdims=True)                 # (1, C)
    p_ref[...] = (u * K) / jnp.maximum(s, EPS)


def ot_forward(kmat):
    S, C = kmat.shape
    return pl.pallas_call(
        sinkhorn_kernel,
        out_shape=jax.ShapeDtypeStruct((S, C), jnp.float32),
        in_specs=[_full_spec((S, C))],
        out_specs=_full_spec((S, C)),
        compiler_params=pltpu.CompilerParams(vmem_limit_bytes=VMEM_LIMIT),
        cost_estimate=pl.CostEstimate(
            flops=4 * S * C * SINKHORN_ITERS + 3 * S * C,
            transcendentals=2 * (S + C) * SINKHORN_ITERS,
            bytes_accessed=8 * S * C,
        ),
    )(kmat)


# --------------------------------------------------------------------------
# scDOT forward: (NNLS_output, OT_output)
# --------------------------------------------------------------------------
@jax.jit
def scdot_forward(sc_x, st_x, markers):
    sc_x = sc_x.astype(jnp.float32)
    st_x = st_x.astype(jnp.float32)
    markers = markers.astype(jnp.float32)

    # cheap pre-pass: inverse row norms (rank-1 scaling of the dot products)
    inv_st = lax.rsqrt(jnp.sum(st_x * st_x, axis=1, keepdims=True) + EPS)   # (S, 1)
    inv_sc = lax.rsqrt(jnp.sum(sc_x * sc_x, axis=1) + EPS)[None, :]         # (1, C)

    # self.M (cosine distance) is fused straight into the Gibbs kernel K.
    kmat = cosine_gibbs(st_x, sc_x, inv_st, inv_sc)   # (n_spots, n_cells)

    nnls_out = nnls_forward(markers, st_x)            # (n_spots, n_celltypes)
    ot_out = ot_forward(kmat)                         # (n_spots, n_cells)
    return nnls_out, ot_out


if __name__ == "__main__":
    key = jax.random.PRNGKey(0)
    k_sc, k_st, k_mk = jax.random.split(key, 3)

    n_cells, n_spots, n_genes, n_celltypes = 24, 16, 32, 8

    # non-negative "expression" data (keeps NNLS rows strictly positive, as in
    # real count data), deterministic from PRNGKey(0)
    sc_x = jax.random.uniform(k_sc, (n_cells, n_genes), jnp.float32) + 0.1
    st_x = jax.random.uniform(k_st, (n_spots, n_genes), jnp.float32) + 0.1
    markers = jax.random.uniform(k_mk, (n_celltypes, n_genes), jnp.float32) + 0.1

    nnls_out, ot_out = scdot_forward(sc_x, st_x, markers)
    jax.block_until_ready((nnls_out, ot_out))

    assert nnls_out.shape == (n_spots, n_celltypes)
    assert ot_out.shape == (n_spots, n_cells)
    assert bool(jnp.all(jnp.isfinite(nnls_out)))
    assert bool(jnp.all(jnp.isfinite(ot_out)))
    # NNLS rows sum to 1, OT columns sum to 1
    assert bool(jnp.allclose(jnp.sum(nnls_out, axis=1), 1.0, atol=1e-4))
    assert bool(jnp.allclose(jnp.sum(ot_out, axis=0), 1.0, atol=1e-4))

    print("KERNEL_OK")
</pallas_src>

<mosaic_0001>
module attributes {stable_mosaic.version = 11 : i64} {
  func.func @cos_to_k_kernel(%arg0: i32, %arg1: i32, %arg2: i32, %arg3: memref<16x32xbf16, #tpu.memory_space<vmem>>, %arg4: memref<24x32xbf16, #tpu.memory_space<vmem>>, %arg5: memref<16x1xf32, #tpu.memory_space<vmem>>, %arg6: memref<1x24xf32, #tpu.memory_space<vmem>>, %arg7: memref<16x24xf32, #tpu.memory_space<vmem>>, %arg8: memref<16x24xf32, #tpu.memory_space<vmem>>) attributes {dimension_semantics = [#tpu.dimension_semantics<parallel>, #tpu.dimension_semantics<parallel>, #tpu.dimension_semantics<arbitrary>], iteration_bounds = array<i64: 1, 1, 1>, scalar_prefetch = 0 : i64, scratch_operands = 1 : i64, tpu.core_type = #tpu.core_type<tc>, window_params = [{transform_indices = @transform_0, window_bounds = array<i64: 16, 32>}, {transform_indices = @transform_1, window_bounds = array<i64: 24, 32>}, {transform_indices = @transform_2, window_bounds = array<i64: 16, 1>}, {transform_indices = @transform_3, window_bounds = array<i64: 1, 24>}, {transform_indices = @transform_4, window_bounds = array<i64: 16, 24>}]} {
    %c0_i32 = arith.constant 0 : i32
    %0 = arith.cmpi eq, %arg2, %c0_i32 : i32
    %1 = arith.extui %0 : i1 to i32
    %c0_i32_0 = arith.constant 0 : i32
    %2 = arith.cmpi ne, %1, %c0_i32_0 : i32
    scf.if %2 {
      %cst_10 = arith.constant 0.000000e+00 : f32
      %12 = vector.broadcast %cst_10 : f32 to vector<16x24xf32>
      %c0_11 = arith.constant 0 : index
      %c0_12 = arith.constant 0 : index
      %13 = vector.load %arg8[%c0_11, %c0_12] : memref<16x24xf32, #tpu.memory_space<vmem>>, vector<16x24xf32>
      tpu.vector_store %arg8[%c0_11, %c0_12], %12 {strides = array<i32>} : memref<16x24xf32, #tpu.memory_space<vmem>>, vector<16x24xf32>,
    } else {
    }
    %c0 = arith.constant 0 : index
    %c0_1 = arith.constant 0 : index
    %3 = vector.load %arg8[%c0, %c0_1] : memref<16x24xf32, #tpu.memory_space<vmem>>, vector<16x24xf32>
    %c0_2 = arith.constant 0 : index
    %c0_3 = arith.constant 0 : index
    %4 = vector.load %arg3[%c0_2, %c0_3] : memref<16x32xbf16, #tpu.memory_space<vmem>>, vector<16x32xbf16>
    %c0_4 = arith.constant 0 : index
    %c0_5 = arith.constant 0 : index
    %5 = vector.load %arg4[%c0_4, %c0_5] : memref<24x32xbf16, #tpu.memory_space<vmem>>, vector<24x32xbf16>
    %cst = arith.constant dense<0.000000e+00> : vector<16x24xf32>
    %6 = tpu.matmul %4, %5, %cst {dimension_numbers = #tpu.dot_dimension_numbers<[1], [1], [0], [0], [0, 0, 1, 0], [], []>} : vector<16x32xbf16>, vector<24x32xbf16>, vector<16x24xf32> -> vector<16x24xf32>
    %7 = arith.addf %3, %6 : vector<16x24xf32>
    %c0_6 = arith.constant 0 : index
    %c0_7 = arith.constant 0 : index
    %8 = vector.load %arg8[%c0_6, %c0_7] : memref<16x24xf32, #tpu.memory_space<vmem>>, vector<16x24xf32>
    tpu.vector_store %arg8[%c0_6, %c0_7], %7 {strides = array<i32>} : memref<16x24xf32, #tpu.memory_space<vmem>>, vector<16x24xf32>,
    %c0_i32_8 = arith.constant 0 : i32
    %9 = arith.cmpi eq, %arg2, %c0_i32_8 : i32
    %10 = arith.extui %9 : i1 to i32
    %c0_i32_9 = arith.constant 0 : i32
    %11 = arith.cmpi ne, %10, %c0_i32_9 : i32
    scf.if %11 {
      %c0_10 = arith.constant 0 : index
      %c0_11 = arith.constant 0 : index
      %12 = vector.load %arg8[%c0_10, %c0_11] : memref<16x24xf32, #tpu.memory_space<vmem>>, vector<16x24xf32>
      %c0_12 = arith.constant 0 : index
      %c0_13 = arith.constant 0 : index
      %13 = vector.load %arg5[%c0_12, %c0_13] : memref<16x1xf32, #tpu.memory_space<vmem>>, vector<16x1xf32>
      %14 = vector.broadcast %13 : vector<16x1xf32> to vector<16x24xf32>
      %15 = arith.mulf %12, %14 : vector<16x24xf32>
      %c0_14 = arith.constant 0 : index
      %c0_15 = arith.constant 0 : index
      %16 = vector.load %arg6[%c0_14, %c0_15] : memref<1x24xf32, #tpu.memory_space<vmem>>, vector<1x24xf32>
      %17 = vector.broadcast %16 : vector<1x24xf32> to vector<16x24xf32>
      %18 = arith.mulf %15, %17 : vector<16x24xf32>
      %cst_16 = arith.constant 1.000000e+00 : f32
      %19 = vector.broadcast %cst_16 : f32 to vector<16x24xf32>
      %20 = arith.subf %19, %18 : vector<16x24xf32>
      %cst_17 = arith.constant -1.000000e+00 : f32
      %21 = vector.broadcast %cst_17 : f32 to vector<16x24xf32>
      %22 = arith.mulf %21, %20 : vector<16x24xf32>
      %23 = math.exp %22 : vector<16x24xf32>
      %c0_18 = arith.constant 0 : index
      %c0_19 = arith.constant 0 : index
      %24 = vector.load %arg7[%c0_18, %c0_19] : memref<16x24xf32, #tpu.memory_space<vmem>>, vector<16x24xf32>
      tpu.vector_store %arg7[%c0_18, %c0_19], %23 {strides = array<i32>} : memref<16x24xf32, #tpu.memory_space<vmem>>, vector<16x24xf32>,
    } else {
    }
    return
  }
  func.func @transform_0(%arg0: i32, %arg1: i32, %arg2: i32) -> (i32, i32) {
    %c0_i32 = arith.constant 0 : i32
    return %arg0, %arg2 : i32, i32
  }
  func.func @transform_1(%arg0: i32, %arg1: i32, %arg2: i32) -> (i32, i32) {
    %c0_i32 = arith.constant 0 : i32
    return %arg1, %arg2 : i32, i32
  }
  func.func @transform_2(%arg0: i32, %arg1: i32, %arg2: i32) -> (i32, i32) {
    %c0_i32 = arith.constant 0 : i32
    %c0_i32_0 = arith.constant 0 : i32
    return %arg0, %c0_i32 : i32, i32
  }
  func.func @transform_3(%arg0: i32, %arg1: i32, %arg2: i32) -> (i32, i32) {
    %c0_i32 = arith.constant 0 : i32
    %c0_i32_0 = arith.constant 0 : i32
    return %c0_i32, %arg1 : i32, i32
  }
  func.func @transform_4(%arg0: i32, %arg1: i32, %arg2: i32) -> (i32, i32) {
    %c0_i32 = arith.constant 0 : i32
    return %arg0, %arg1 : i32, i32
  }
}

module attributes {stable_mosaic.version = 11 : i64} {
  func.func @nnls_kernel(%arg0: i32, %arg1: i32, %arg2: memref<8x32xbf16, #tpu.memory_space<vmem>>, %arg3: memref<16x32xbf16, #tpu.memory_space<vmem>>, %arg4: memref<8x16xf32, #tpu.memory_space<vmem>>, %arg5: memref<8x8xf32, #tpu.memory_space<vmem>>, %arg6: memref<8x16xf32, #tpu.memory_space<vmem>>) attributes {dimension_semantics = [#tpu.dimension_semantics<parallel>, #tpu.dimension_semantics<arbitrary>], iteration_bounds = array<i64: 1, 1>, scalar_prefetch = 0 : i64, scratch_operands = 2 : i64, tpu.core_type = #tpu.core_type<tc>, window_params = [{transform_indices = @transform_0, window_bounds = array<i64: 8, 32>}, {transform_indices = @transform_1, window_bounds = array<i64: 16, 32>}, {transform_indices = @transform_2, window_bounds = array<i64: 8, 16>}]} {
    %c0_i32 = arith.constant 0 : i32
    %0 = arith.cmpi eq, %arg1, %c0_i32 : i32
    %1 = arith.extui %0 : i1 to i32
    %c0_i32_0 = arith.constant 0 : i32
    %2 = arith.cmpi ne, %1, %c0_i32_0 : i32
    scf.if %2 {
      %cst_15 = arith.constant 0.000000e+00 : f32
      %16 = vector.broadcast %cst_15 : f32 to vector<8x8xf32>
      %c0_16 = arith.constant 0 : index
      %c0_17 = arith.constant 0 : index
      %17 = vector.load %arg5[%c0_16, %c0_17] : memref<8x8xf32, #tpu.memory_space<vmem>>, vector<8x8xf32>
      tpu.vector_store %arg5[%c0_16, %c0_17], %16 {strides = array<i32>} : memref<8x8xf32, #tpu.memory_space<vmem>>, vector<8x8xf32>,
      %cst_18 = arith.constant 0.000000e+00 : f32
      %18 = vector.broadcast %cst_18 : f32 to vector<8x16xf32>
      %c0_19 = arith.constant 0 : index
      %c0_20 = arith.constant 0 : index
      %19 = vector.load %arg6[%c0_19, %c0_20] : memref<8x16xf32, #tpu.memory_space<vmem>>, vector<8x16xf32>
      tpu.vector_store %arg6[%c0_19, %c0_20], %18 {strides = array<i32>} : memref<8x16xf32, #tpu.memory_space<vmem>>, vector<8x16xf32>,
    } else {
    }
    %c0 = arith.constant 0 : index
    %c0_1 = arith.constant 0 : index
    %3 = vector.load %arg2[%c0, %c0_1] : memref<8x32xbf16, #tpu.memory_space<vmem>>, vector<8x32xbf16>
    %c0_2 = arith.constant 0 : index
    %c0_3 = arith.constant 0 : index
    %4 = vector.load %arg3[%c0_2, %c0_3] : memref<16x32xbf16, #tpu.memory_space<vmem>>, vector<16x32xbf16>
    %c0_4 = arith.constant 0 : index
    %c0_5 = arith.constant 0 : index
    %5 = vector.load %arg5[%c0_4, %c0_5] : memref<8x8xf32, #tpu.memory_space<vmem>>, vector<8x8xf32>
    %cst = arith.constant dense<0.000000e+00> : vector<8x8xf32>
    %6 = tpu.matmul %3, %3, %cst {dimension_numbers = #tpu.dot_dimension_numbers<[1], [1], [0], [0], [0, 0, 1, 0], [], []>} : vector<8x32xbf16>, vector<8x32xbf16>, vector<8x8xf32> -> vector<8x8xf32>
    %7 = arith.addf %5, %6 : vector<8x8xf32>
    %c0_6 = arith.constant 0 : index
    %c0_7 = arith.constant 0 : index
    %8 = vector.load %arg5[%c0_6, %c0_7] : memref<8x8xf32, #tpu.memory_space<vmem>>, vector<8x8xf32>
    tpu.vector_store %arg5[%c0_6, %c0_7], %7 {strides = array<i32>} : memref<8x8xf32, #tpu.memory_space<vmem>>, vector<8x8xf32>,
    %c0_8 = arith.constant 0 : index
    %c0_9 = arith.constant 0 : index
    %9 = vector.load %arg6[%c0_8, %c0_9] : memref<8x16xf32, #tpu.memory_space<vmem>>, vector<8x16xf32>
    %cst_10 = arith.constant dense<0.000000e+00> : vector<8x16xf32>
    %10 = tpu.matmul %3, %4, %cst_10 {dimension_numbers = #tpu.dot_dimension_numbers<[1], [1], [0], [0], [0, 0, 1, 0], [], []>} : vector<8x32xbf16>, vector<16x32xbf16>, vector<8x16xf32> -> vector<8x16xf32>
    %11 = arith.addf %9, %10 : vector<8x16xf32>
    %c0_11 = arith.constant 0 : index
    %c0_12 = arith.constant 0 : index
    %12 = vector.load %arg6[%c0_11, %c0_12] : memref<8x16xf32, #tpu.memory_space<vmem>>, vector<8x16xf32>
    tpu.vector_store %arg6[%c0_11, %c0_12], %11 {strides = array<i32>} : memref<8x16xf32, #tpu.memory_space<vmem>>, vector<8x16xf32>,
    %c0_i32_13 = arith.constant 0 : i32
    %13 = arith.cmpi eq, %arg1, %c0_i32_13 : i32
    %14 = arith.extui %13 : i1 to i32
    %c0_i32_14 = arith.constant 0 : i32
    %15 = arith.cmpi ne, %14, %c0_i32_14 : i32
    scf.if %15 {
      %c0_15 = arith.constant 0 : index
      %c0_16 = arith.constant 0 : index
      %16 = vector.load %arg5[%c0_15, %c0_16] : memref<8x8xf32, #tpu.memory_space<vmem>>, vector<8x8xf32>
      %c0_17 = arith.constant 0 : index
      %c0_18 = arith.constant 0 : index
      %17 = vector.load %arg6[%c0_17, %c0_18] : memref<8x16xf32, #tpu.memory_space<vmem>>, vector<8x16xf32>
      %18 = tpu.iota {dimensions = array<i32: 0>} : vector<8x8xi32>
      %19 = tpu.iota {dimensions = array<i32: 1>} : vector<8x8xi32>
      %20 = arith.cmpi eq, %18, %19 : vector<8x8xi32>
      %cst_19 = arith.constant 0.000000e+00 : f32
      %21 = vector.broadcast %cst_19 : f32 to vector<8x8xf32>
      %22 = arith.select %20, %16, %21 : vector<8x8xi1>, vector<8x8xf32>
      %23 = vector.shape_cast %22 : vector<8x8xf32> to vector<1x8x8xf32>
      %cst_20 = arith.constant dense<0.000000e+00> : vector<1xf32>
      %24 = vector.multi_reduction <add>, %23, %cst_20 [1, 2] : vector<1x8x8xf32> to vector<1xf32>
      %25 = vector.shape_cast %24 : vector<1xf32> to vector<1x1x1xf32>
      %26 = vector.extract %25[0, 0, 0] : f32 from vector<1x1x1xf32>
      %cst_21 = arith.constant 9.99999996E-13 : f32
      %27 = arith.addf %26, %cst_21 : f32
      %cst_22 = arith.constant 1.000000e+00 : f32
      %28 = arith.divf %cst_22, %27 : f32
      %cst_23 = arith.constant 0.000000e+00 : f32
      %29 = vector.broadcast %cst_23 : f32 to vector<8x16xf32>
      %c0_i32_24 = arith.constant 0 : i32
      %c200_i32 = arith.constant 200 : i32
      %30 = arith.addi %c0_i32_24, %c200_i32 : i32
      %c1_i32 = arith.constant 1 : i32
      %31 = scf.for %arg7 = %c0_i32_24 to %30 step %c1_i32 iter_args(%arg8 = %29) -> (vector<8x16xf32>)  : i32 {
        %cst_29 = arith.constant dense<0.000000e+00> : vector<8x16xf32>
        %39 = tpu.matmul %16, %arg8, %cst_29 {dimension_numbers = #tpu.dot_dimension_numbers<[1], [0], [0], [1], [0, 0, 1, 1], [], []>} : vector<8x8xf32>, vector<8x16xf32>, vector<8x16xf32> -> vector<8x16xf32>
        %40 = arith.subf %39, %17 : vector<8x16xf32>
        %41 = vector.broadcast %28 : f32 to vector<8x16xf32>
        %42 = arith.mulf %41, %40 : vector<8x16xf32>
        %43 = arith.subf %arg8, %42 : vector<8x16xf32>
        %cst_30 = arith.constant 0.000000e+00 : f32
        %44 = vector.broadcast %cst_30 : f32 to vector<8x16xf32>
        %45 = arith.maximumf %43, %44 : vector<8x16xf32>
        scf.yield %45 : vector<8x16xf32>
      }
      %cst_25 = arith.constant dense<0.000000e+00> : vector<16xf32>
      %32 = vector.multi_reduction <add>, %31, %cst_25 [0] : vector<8x16xf32> to vector<16xf32>
      %33 = vector.shape_cast %32 : vector<16xf32> to vector<1x16xf32>
      %cst_26 = arith.constant 9.99999996E-13 : f32
      %34 = vector.broadcast %cst_26 : f32 to vector<1x16xf32>
      %35 = arith.maximumf %33, %34 : vector<1x16xf32>
      %36 = vector.broadcast %35 : vector<1x16xf32> to vector<8x16xf32>
      %37 = arith.divf %31, %36 : vector<8x16xf32>
      %c0_27 = arith.constant 0 : index
      %c0_28 = arith.constant 0 : index
      %38 = vector.load %arg4[%c0_27, %c0_28] : memref<8x16xf32, #tpu.memory_space<vmem>>, vector<8x16xf32>
      tpu.vector_store %arg4[%c0_27, %c0_28], %37 {strides = array<i32>} : memref<8x16xf32, #tpu.memory_space<vmem>>, vector<8x16xf32>,
    } else {
    }
    return
  }
  func.func @transform_0(%arg0: i32, %arg1: i32) -> (i32, i32) {
    %c0_i32 = arith.constant 0 : i32
    %c0_i32_0 = arith.constant 0 : i32
    return %c0_i32, %arg1 : i32, i32
  }
  func.func @transform_1(%arg0: i32, %arg1: i32) -> (i32, i32) {
    %c0_i32 = arith.constant 0 : i32
    return %arg0, %arg1 : i32, i32
  }
  func.func @transform_2(%arg0: i32, %arg1: i32) -> (i32, i32) {
    %c0_i32 = arith.constant 0 : i32
    %c0_i32_0 = arith.constant 0 : i32
    return %c0_i32, %arg0 : i32, i32
  }
}

module attributes {stable_mosaic.version = 11 : i64} {
  func.func @sinkhorn_kernel(%arg0: memref<16x24xf32, #tpu.memory_space<vmem>>, %arg1: memref<16x24xf32, #tpu.memory_space<vmem>>) attributes {dimension_semantics = [], scalar_prefetch = 0 : i64, scratch_operands = 0 : i64, tpu.core_type = #tpu.core_type<tc>} {
    %c0 = arith.constant 0 : index
    %c0_0 = arith.constant 0 : index
    %0 = vector.load %arg0[%c0, %c0_0] : memref<16x24xf32, #tpu.memory_space<vmem>>, vector<16x24xf32>
    %cst = arith.constant 1.000000e+00 : f32
    %1 = vector.broadcast %cst : f32 to vector<16x1xf32>
    %cst_1 = arith.constant 1.000000e+00 : f32
    %2 = vector.broadcast %cst_1 : f32 to vector<1x24xf32>
    %c0_i32 = arith.constant 0 : i32
    %c100_i32 = arith.constant 100 : i32
    %3 = arith.addi %c0_i32, %c100_i32 : i32
    %c1_i32 = arith.constant 1 : i32
    %4:2 = scf.for %arg2 = %c0_i32 to %3 step %c1_i32 iter_args(%arg3 = %1, %arg4 = %2) -> (vector<16x1xf32>, vector<1x24xf32>)  : i32 {
      %16 = vector.broadcast %arg4 : vector<1x24xf32> to vector<16x24xf32>
      %17 = arith.mulf %0, %16 : vector<16x24xf32>
      %cst_6 = arith.constant dense<0.000000e+00> : vector<16xf32>
      %18 = vector.multi_reduction <add>, %17, %cst_6 [1] : vector<16x24xf32> to vector<16xf32>
      %19 = vector.shape_cast %18 : vector<16xf32> to vector<16x1xf32>
      %20 = tpu.reciprocal %19 {approx = true} : vector<16x1xf32> -> vector<16x1xf32>
      %cst_7 = arith.constant 6.250000e-02 : f32
      %21 = vector.broadcast %cst_7 : f32 to vector<16x1xf32>
      %22 = arith.mulf %21, %20 : vector<16x1xf32>
      %23 = vector.broadcast %22 : vector<16x1xf32> to vector<16x24xf32>
      %24 = arith.mulf %0, %23 : vector<16x24xf32>
      %cst_8 = arith.constant dense<0.000000e+00> : vector<24xf32>
      %25 = vector.multi_reduction <add>, %24, %cst_8 [0] : vector<16x24xf32> to vector<24xf32>
      %26 = vector.shape_cast %25 : vector<24xf32> to vector<1x24xf32>
      %27 = tpu.reciprocal %26 {approx = true} : vector<1x24xf32> -> vector<1x24xf32>
      %cst_9 = arith.constant 0.0416666679 : f32
      %28 = vector.broadcast %cst_9 : f32 to vector<1x24xf32>
      %29 = arith.mulf %28, %27 : vector<1x24xf32>
      scf.yield %22, %29 : vector<16x1xf32>, vector<1x24xf32>
    }
    %5 = vector.broadcast %4#0 : vector<16x1xf32> to vector<16x24xf32>
    %6 = arith.mulf %0, %5 : vector<16x24xf32>
    %cst_2 = arith.constant dense<0.000000e+00> : vector<24xf32>
    %7 = vector.multi_reduction <add>, %6, %cst_2 [0] : vector<16x24xf32> to vector<24xf32>
    %8 = vector.shape_cast %7 : vector<24xf32> to vector<1x24xf32>
    %9 = vector.broadcast %4#0 : vector<16x1xf32> to vector<16x24xf32>
    %10 = arith.mulf %9, %0 : vector<16x24xf32>
    %cst_3 = arith.constant 9.99999996E-13 : f32
    %11 = vector.broadcast %cst_3 : f32 to vector<1x24xf32>
    %12 = arith.maximumf %8, %11 : vector<1x24xf32>
    %13 = vector.broadcast %12 : vector<1x24xf32> to vector<16x24xf32>
    %14 = arith.divf %10, %13 : vector<16x24xf32>
    %c0_4 = arith.constant 0 : index
    %c0_5 = arith.constant 0 : index
    %15 = vector.load %arg1[%c0_4, %c0_5] : memref<16x24xf32, #tpu.memory_space<vmem>>, vector<16x24xf32>
    tpu.vector_store %arg1[%c0_4, %c0_5], %14 {strides = array<i32>} : memref<16x24xf32, #tpu.memory_space<vmem>>, vector<16x24xf32>,
    return
  }
}

</mosaic_0001>

<bundles_post_ra>
// kernel: scdot_forward.5
= control target key start
LH: loop header
LB: loop body
LE: loop exit
PB: predicated region body
PF: predicated region fallthrough
CT: control target
= control target key end

     0   :  { %6 = vsyncpa [#allocation3], 0  ;;  %v151_v2 = vmov 1.0   ;;  %s178_s10 = smov 0   ;;  %s195_s0 = inlined_call_operand.vmem [shape: f32[16,24], index: 0, kind: input, shape index: {}]   ;;  %s196_s1 = inlined_call_operand.hbm [shape: f32[16,24], index: 1, kind: output, shape index: {}]  }
   0x1   :  { %v9_v0 = vld [vmem:[%s195_s0] sm:$0xff]  ;;  %v10_v1 = vld [vmem:[%s195_s0 + $0x8] sm:$0xff] }
   0x2 LB: > { %vm22_vm0 = vcmask 195584   ;;  %v20_v3 = vmul.f32 %v153_v2, %v9_v0  ;;  %v21_v4 = vmul.f32 %v153_v2, %v10_v1  ;;  %s16_s10 = sadd.s32 1, %s157_s10   ;;  %s157_s10 = sphi %s178_s10, %s16_s10   ;;  %v153_v2 = vphi %v151_v2, %v45_v2  }
   0x3   : > { %p13_p0 = scmp.ge.s32.totalorder %s16_s10, 100  }
   0x4   : > { %v23_v5 = vsel %vm22_vm0, %v20_v3, 0.0  ;;  %v26_v6 = vsel %vm22_vm0, %v21_v4, 0.0  ;;  %s159_s0 = smov (%p13_p0), [#allocation2]  }
   0x5   : > { %24 = vadd.xlane.f32.xlu0 %v23_v5  ;;  %s69_s11 = sshll.u32 (%p13_p0), %s159_s0, 4  ;;  %s70_s11 = int_to_ptr.vmem [resolvable:$true] %s69_s11 }
   0x6   :  { %s121_s12 = scalar_lea.vmem (%p13_p0), %s70_s11, 256  ;;  %p126_p2 = scmp.lt.s32.totalorder (%p13_p0), %s70_s11, %s70_s11 }
   0x7   :  { %p122_p1 = scmp.ne.s32.totalorder (%p13_p0), %s70_s11, %s121_s12  ;;  %p127_p3 = scmp.lt.s32.totalorder (%p13_p0), %s121_s12, %s121_s12 }
   0x9   : > { %27 = vadd.xlane.f32.xlu0 %v26_v6  ;;  %p128_p4 = por (%p13_p0), %p127_p3, %p126_p2 }
   0xb   :  { %p129_p5 = pnand (%p13_p0), %p128_p4, %p122_p1 }
  0x8e   : > { %v25_v7 = vpop.xlane.xlu0 %24 }
  0x8f   : > { %113 = vrcp.f32 %v25_v7 }
  0x92   : > { %v28_v8 = vpop.xlane.xlu0 %27 }
  0x93   : > { %115 = vrcp.f32 %v28_v8 }
  0x9c   : > { %v114_v9 = vpop.eup %113 }
  0x9d   : > { %v31_v10 = vmul.f32 0.0625, %v114_v9 }
  0x9f   : > { %v33_v12 = vmul.f32 %v31_v10, %v9_v0 }
  0xa0   : > { %v116_v11 = vpop.eup %115 }
  0xa1   : > { %v32_v13 = vmul.f32 0.0625, %v116_v11  ;;  %v35_v15 = vsel %vm22_vm0, %v33_v12, 0.0 }
  0xa3   : > { %v34_v14 = vmul.f32 %v32_v13, %v10_v1 }
  0xa5   : > { %v36_v16 = vsel %vm22_vm0, %v34_v14, 0.0 }
  0xa6   : > { %v37_v17 = vadd.f32 %v36_v16, %v35_v15 }
  0xa8   : > { %v38_v18 = vrot.slane %v37_v17, 4 }
  0xaa   : > { %v39_v19 = vadd.f32 %v38_v18, %v37_v17 }
  0xac   : > { %v40_v20 = vrot.slane %v39_v19, 2 }
  0xae   : > { %v41_v21 = vadd.f32 %v40_v20, %v39_v19 }
  0xb0   : > { %v42_v22 = vrot.slane %v41_v21, 1 }
  0xb2   : > { %v43_v23 = vadd.f32 %v42_v22, %v41_v21 }
  0xb4   : > { %117 = vrcp.f32 %v43_v23  ;;  %v58_v25 = vmax.f32 (%p13_p0), %v43_v23, 1e-12 }
  0xb6   :  { %119 = vrcp.f32 (%p13_p0), %v58_v25 }
  0xbe   :  { %15 = sbr.rel (!%p13_p0) target bundleno = 2 (0x2), region = 31 }
  0xc1   : > { %v118_v24 = vpop.eup %117 }
  0xc2   : > { %v45_v2 = vmul.f32 0.041666668, %v118_v24  }
  0xc3   :  { %v120_v26 = vpop.eup %119 }
  0xc4   :  { %v60_v27 = vmul.f32 %v120_v26, %v33_v12  ;;  %v61_v28 = vmul.f32 %v120_v26, %v34_v14 }
  0xc6   :  { %62 = vst.msk [vmem:[#allocation2] sm:$0xff] %vm22_vm0, %v60_v27  ;;  %63 = vst.msk [vmem:[#allocation2 + $0x8] sm:$0xff] %vm22_vm0, %v61_v28 }
  0xc7   :  { %132 = shalt.err (!%p129_p5)
}
  0xc8   :  { %s160_s13 = smov 128   ;;  %s161_s14 = smov 8  }
  0xc9   :  { %75 = dma.vmem_to_hbm [thread:$0]  %s70_s11, 256, %s196_s1, [#allocation3], %s160_s13, %s160_s13, %s161_s14  }
  0xca   :  { %149 = dma.done.wait [#allocation3], 256  }
  0xcb   :  { %150 = vsyncadd [#allocation3], 4294967040 }
  0xcc   :  { %79 = vsyncpa [#allocation3], 1 }

// kernel: scdot_forward.3
= control target key start
LH: loop header
LB: loop body
LE: loop exit
PB: predicated region body
PF: predicated region fallthrough
CT: control target
= control target key end

     0   :  { %vm45_vm0 = vcmask 261120   ;;  %v170_v0 = vmov 0.0   ;;  %vm171_vm1 = vmmov 0   ;;  %v172_v2 = vmov 0   ;;  %s231_s1 = inlined_call_operand.vmem [shape: bf16[24,32], index: 1, kind: input, shape index: {}]   ;;  %s232_s2 = inlined_call_operand.vmem [shape: f32[16,1], index: 2, kind: input, shape index: {}]   ;;  %s233_s0 = inlined_call_operand.vmem [shape: bf16[16,32], index: 0, kind: input, shape index: {}]   ;;  %s234_s3 = inlined_call_operand.vmem [shape: f32[1,24], index: 3, kind: input, shape index: {}]   ;;  %s235_s4 = inlined_call_operand.vmem [shape: f32[16,24], index: 4, kind: output, shape index: {}]  }
   0x1   :  { %151 = vmatprep.subr.bf16.mxu0 %v170_v0  ;;  %v163_v1 = vld [vmem:[%s231_s1 + $0x8] ss:$0 sps:$4 sm:$0xff]   ;;  %155 = vmatprep.mubr.msk.bf16.mxu0 %vm171_vm1, %v170_v0  ;;  %vm22_vm2 = vcmask 195584   ;;  %v106_v4 = vld [vmem:[%s232_s2] sm:$0xff] }
   0x2   :  { %162 = vset.pattern.permute.xlu0 %v172_v2  ;;  %v53_v3 = vsel %vm45_vm0, %v163_v1, 0  ;;  %23 = vst.msk [vmem:[#allocation2] sm:$0xff] %vm22_vm2, %v170_v0  ;;  %24 = vst.msk [vmem:[#allocation2 + $0x8] sm:$0xff] %vm22_vm2, %v170_v0  ;;  %v164_v5 = vld [vmem:[%s231_s1] sm:$0xff]   ;;  %v107_v6 = vld [vmem:[%s232_s2 + $0x8] sm:$0xff] }
   0x3   :  { %152 = vmatpush3.bf16.xpose.msra.mxu0 %v53_v3  ;;  %110 = vperm.xlu0 %162, %v106_v4   ;;  %v50_v7 = vsel %vm45_vm0, %v164_v5, 0  ;;  %v165_v8 = vld [vmem:[%s233_s0] sm:$0xff]  }
   0x4   :  { %153 = vmatprep.subr.bf16.mxu0 %v170_v0  ;;  %v147_v18 = vld [vmem:[%s234_s3] ss:$0 sm:$0xff] }
   0x7   :  { %115 = vperm.xlu0 %162, %v107_v6  }
   0x9   :  { %v25_v9 = vld [vmem:[#allocation2] sm:$0xff]  ;;  %v26_v13 = vld [vmem:[#allocation2 + $0x8] sm:$0xff] }
   0xb   :  { %154 = vmatpush3.bf16.xpose.msra.mxu0 %v50_v7 }
  0x12   :  { %156 = vmatmul.mubr.msk.bf16.vlgmr.msra.gmra.mxu0 %vm45_vm0, %v165_v8 }
  0x7e   :  { %v111_v17 = vpop.permute.xlu0 %110 }
  0x82   :  { %v116_v22 = vpop.permute.xlu0 %115 }
  0xd2   :  { %v89_v10 = vpop.f32.mrf.mxu0 }
  0xd3   :  { %v96_v11 = vadd.f32 %v89_v10, %v25_v9 }
  0xd4   :  { %v157_v12 = vpop.f32.mrf.mxu0 }
  0xd5   :  { %99 = vst.msk [vmem:[#allocation2] sm:$0xff] %vm22_vm2, %v96_v11 }
  0xd6   :  { %v92_v14 = vpop.f32.mrf.mxu0 }
  0xd7   :  { %v97_v15 = vadd.f32 %v92_v14, %v26_v13 }
  0xd8   :  { %v158_v16 = vpop.f32.mrf.mxu0 }
  0xd9   :  { %100 = vst.msk [vmem:[#allocation2 + $0x8] sm:$0xff] %vm22_vm2, %v97_v15 }
  0xdc   :  { %v104_v19 = vld [vmem:[#allocation2] sm:$0xff] }
  0xdd   :  { %v118_v20 = vmul.f32 %v111_v17, %v104_v19 }
  0xdf   :  { %v127_v21 = vmul.f32 %v147_v18, %v118_v20 }
  0xe0   :  { %v105_v23 = vld [vmem:[#allocation2 + $0x8] sm:$0xff] }
  0xe1   :  { %v129_v24 = vsub.f32 1.0, %v127_v21  ;;  %v119_v25 = vmul.f32 %v116_v22, %v105_v23 }
  0xe3   :  { %v131_v26 = vmul.f32 -1.0, %v129_v24  ;;  %v128_v27 = vmul.f32 %v147_v18, %v119_v25 }
  0xe5   :  { %v133_v28 = vmul.f32 1.442695, %v131_v26  ;;  %v130_v29 = vsub.f32 1.0, %v128_v27 }
  0xe7   :  { %166 = vpow2.f32 %v133_v28  ;;  %v132_v30 = vmul.f32 -1.0, %v130_v29 }
  0xe9   :  { %v135_v31 = vmul.f32 1.442695, %v132_v30 }
  0xeb   :  { %168 = vpow2.f32 %v135_v31 }
  0xf4   :  { %v167_v32 = vpop.eup %166 }
  0xf5   :  { %137 = vst.msk [vmem:[%s235_s4] sm:$0xff] %vm22_vm2, %v167_v32 }
  0xf8   :  { %v169_v33 = vpop.eup %168 }
  0xf9   :  { %138 = vst.msk [vmem:[%s235_s4 + $0x8] sm:$0xff] %vm22_vm2, %v169_v33 }

// kernel: scdot_forward.4
= control target key start
LH: loop header
LB: loop body
LE: loop exit
PB: predicated region body
PF: predicated region fallthrough
CT: control target
= control target key end

     0   :  { %7 = vsyncpa [#allocation5], 0  ;;  %vm25_vm0 = vcmask 261120   ;;  %v362_v1 = vmov 0.0   ;;  %vm17_vm1 = vcmask 64512   ;;  %vm363_vm2 = vmmov 0   ;;  %s399_s0 = inlined_call_operand.vmem [shape: bf16[8,32], index: 0, kind: input, shape index: {}]   ;;  %s400_s1 = inlined_call_operand.vmem [shape: bf16[16,32], index: 1, kind: input, shape index: {}]   ;;  %s401_s2 = inlined_call_operand.hbm [shape: f32[8,16], index: 2, kind: output, shape index: {}]  }
   0x1   :  { %v21_v0 = vld [vmem:[%s399_s0] sm:$0xf]  ;;  %277 = vmatprep.subr.bf16.mxu0 %v362_v1  ;;  %283 = vmatprep.subr.bf16.mxu1 %v362_v1  ;;  %18 = vst.msk [vmem:[#allocation2] sm:$0xff] %vm17_vm1, %v362_v1  ;;  %v129_v7 = vlaneseq  ;;  %vm19_vm4 = vcmask 130048   ;;  %v354_v33 = vmov 0.0   ;;  %s358_s14 = smov 0  }
   0x2   :  { %v27_v2 = vsel %vm25_vm0, %v21_v0, 0  ;;  %279 = vmatprep.mubr.msk.bf16.mxu0 %vm363_vm2, %v362_v1  ;;  %285 = vmatprep.mubr.msk.bf16.mxu1 %vm363_vm2, %v362_v1  ;;  %v319_v3 = vld [vmem:[%s400_s1] sm:$0xff]   ;;  %20 = vst.msk [vmem:[#allocation3] sm:$0xff] %vm19_vm4, %v362_v1 }
   0x3   :  { %278 = vmatpush3.bf16.xpose.msra.mxu0 %v27_v2  ;;  %v79_v4 = vsel %vm25_vm0, %v319_v3, 0  ;;  %v130_v11 = vshrl.u32 %v129_v7, 7  ;;  %v132_v12 = vand.u32 127, %v129_v7 }
   0x4   :  { %284 = vmatpush3.bf16.xpose.msra.mxu1 %v79_v4 }
   0x5   :  { %vm133_vm3 = vcmp.eq.s32.totalorder %v130_v11, %v132_v12 }
   0x8   :  { %v24_v5 = vld [vmem:[#allocation2] sm:$0xff] }
   0x9   :  { %v72_v21 = vld [vmem:[#allocation3] sm:$0xff] }
   0xa   :  { %280 = vmatmul.mubr.msk.bf16.vlgmr.msra.gmra.mxu0 %vm25_vm0, %v21_v0 }
   0xb   :  { %286 = vmatmul.mubr.msk.bf16.vlgmr.msra.gmra.mxu1 %vm25_vm0, %v21_v0 }
  0xca   :  { %v63_v6 = vpop.f32.mrf.mxu0 }
  0xcb   :  { %v69_v8 = vadd.f32 %v63_v6, %v24_v5  ;;  %v115_v17 = vpop.f32.mrf.mxu1 }
  0xcc   :  { %v281_v9 = vpop.f32.mrf.mxu0  ;;  %v121_v22 = vadd.f32 %v115_v17, %v72_v21 }
  0xcd   :  { %71 = vst.msk [vmem:[#allocation2] sm:$0xff] %vm17_vm1, %v69_v8  ;;  %v287_v18 = vpop.f32.mrf.mxu1 }
  0xce   :  { %v66_v10 = vpop.f32.mrf.mxu0  ;;  %123 = vst.msk [vmem:[#allocation3] sm:$0xff] %vm19_vm4, %v121_v22 }
  0xcf   :  { %v118_v19 = vpop.f32.mrf.mxu1 }
  0xd0   :  { %v282_v13 = vpop.f32.mrf.mxu0 }
  0xd1   :  { %v288_v20 = vpop.f32.mrf.mxu1 }
  0xd4   :  { %v127_v14 = vld [vmem:[#allocation2] sm:$0xff] }
  0xd5   :  { %v134_v15 = vsel %vm133_vm3, %v127_v14, 0.0  ;;  %v128_v23 = vld [vmem:[#allocation3] sm:$0xff] }
  0xd6   :  { %v135_v16 = vsel %vm17_vm1, %v134_v15, 0.0 }
  0xd7   :  { %136 = vadd.xlane.f32.xlu0 %v135_v16 }
 0x160   :  { %v137_v24 = vpop.xlane.xlu0 %136 }
 0x161   :  { %v138_v25 = vrot.slane %v137_v24, 4 }
 0x163   :  { %v139_v26 = vadd.f32 %v138_v25, %v137_v24 }
 0x165   :  { %v140_v27 = vrot.slane %v139_v26, 2 }
 0x167   :  { %v141_v28 = vadd.f32 %v140_v27, %v139_v26 }
 0x169   :  { %v142_v29 = vrot.slane %v141_v28, 1 }
 0x16b   :  { %v143_v30 = vadd.f32 %v142_v29, %v141_v28 }
 0x16d   :  { %294 = vpush %v143_v30 }
 0x19e   :  { %s295_s0 = spop %294 }
 0x19f   :  { %s145_s1 = sadd.f32 1e-12, %s295_s0 }
 0x1a1   :  { %v146_v31 = vstv %s145_s1 }
 0x1a2   :  { %320 = vrcp.f32 %v146_v31 }
 0x1af   :  { %v321_v32 = vpop.eup %320 }
 0x1b0   :  { %296 = vpush %v321_v32 }
 0x1e1   :  { %s297_s13 = spop %296 }
 0x1e2 LB: > { %v364_v34 = vmov 0.0   ;;  %vm365_vm5 = vmmov 0   ;;  %v230_v36 = vstv %s297_s13  ;;  %s154_s14 = sadd.s32 1, %s360_s14   ;;  %s360_s14 = sphi %s358_s14, %s154_s14   ;;  %v356_v33 = vphi %v354_v33, %v355_v33  }
 0x1e3   : > { %289 = vmatprep.subr.mxu0 %v364_v34  ;;  %291 = vmatprep.mubr.msk.f32.mxu0 %vm365_vm5, %v364_v34  ;;  %p151_p0 = scmp.ge.s32.totalorder %s154_s14, 200  }
 0x1e4   : > { %290 = vmatpush3.msra.mxu0 %v356_v33  ;;  %s366_s15 = smov (%p151_p0), [#allocation4]  }
 0x1e5   : > { %292 = vmatmul.mubr.msk.f32.vlgmr.msra.gmra.mxu0 %vm17_vm1, %v127_v14  ;;  %s251_s16 = sshll.u32 (%p151_p0), %s366_s15, 4  ;;  %s252_s16 = int_to_ptr.vmem [resolvable:$true] %s251_s16 }
 0x1e6   :  { %s324_s17 = scalar_lea.vmem (%p151_p0), %s252_s16, 128  ;;  %p329_p2 = scmp.lt.s32.totalorder (%p151_p0), %s252_s16, %s252_s16 }
 0x1e7   :  { %p325_p1 = scmp.ne.s32.totalorder (%p151_p0), %s252_s16, %s324_s17  ;;  %p330_p3 = scmp.lt.s32.totalorder (%p151_p0), %s324_s17, %s324_s17 }
 0x1e9   :  { %p331_p4 = por (%p151_p0), %p330_p3, %p329_p2 }
 0x1eb   :  { %p332_p5 = pnand (%p151_p0), %p331_p4, %p325_p1 }
 0x2a5   : > { %v225_v35 = vpop.f32.mrf.mxu0 }
 0x2a6   : > { %v229_v37 = vsub.f32 %v225_v35, %v128_v23 }
 0x2a7   : > { %v293_v38 = vpop.f32.mrf.mxu0 }
 0x2a8   : > { %v231_v39 = vmul.f32 %v230_v36, %v229_v37 }
 0x2aa   : > { %v232_v40 = vsub.f32 %v356_v33, %v231_v39  ;;  %153 = sbr.rel (!%p151_p0) target bundleno = 482 (0x1e2), region = 43 }
 0x2ac   : > { %v233_v41 = vmax.f32 %v232_v40, 0.0  }
 0x2ae   : > { %v355_v33 = vmov %v233_v41   ;;  %v234_v42 = vsel (%p151_p0), %vm19_vm4, %v233_v41, 0.0 }
 0x2af   :  { %v235_v43 = vrot.slane %v234_v42, 4 }
 0x2b1   :  { %v236_v44 = vadd.f32 %v235_v43, %v234_v42 }
 0x2b3   :  { %v237_v45 = vrot.slane %v236_v44, 2 }
 0x2b5   :  { %v238_v46 = vadd.f32 %v237_v45, %v236_v44 }
 0x2b7   :  { %v239_v47 = vrot.slane %v238_v46, 1 }
 0x2b9   :  { %v240_v48 = vadd.f32 %v239_v47, %v238_v46 }
 0x2bb   :  { %v241_v49 = vmax.f32 %v240_v48, 1e-12 }
 0x2bd   :  { %322 = vrcp.f32 %v241_v49 }
 0x2ca   :  { %v323_v50 = vpop.eup %322 }
 0x2cb   :  { %v243_v51 = vmul.f32 %v323_v50, %v233_v41 }
 0x2cd   :  { %244 = vst.msk [vmem:[#allocation4] sm:$0xff] %vm19_vm4, %v243_v51 }
 0x2ce   :  { %335 = shalt.err (!%p332_p5)
}
 0x2cf   :  { %254 = dma.vmem_to_hbm [thread:$0]  %s252_s16, 128, %s401_s2, [#allocation5]  }
 0x2d0   :  { %352 = dma.done.wait [#allocation5], 128  }
 0x2d1   :  { %353 = vsyncadd [#allocation5], 4294967168 }
 0x2d2   :  { %258 = vsyncpa [#allocation5], 1 }

</bundles_post_ra>
